<compile_context>
chip_gen: v7x
topology: tpu7x:2x2x1
jax: 0.10.0
libtpu: 0.0.40
codegen_flags: <defaults>
</compile_context>

<pallas_src>
import jax
import jax.numpy as jnp
from jax.experimental import pallas as pl
from jax.experimental.pallas import tpu as pltpu


def _round_up(x, m):
    return (x + m - 1) // m * m


def _physical_vmem_bytes():
    """Best-effort physical VMEM query (falls back to the v5e/v6e 128 MiB)."""
    try:
        return int(pltpu.get_tpu_info().vmem_capacity_bytes)
    except Exception:
        return 128 << 20


def _tile_footprint_bytes(bb, L, F, H, stream_itemsize):
    """Conservative lane/sublane-padded VMEM working set for one grid step."""
    lane, sub, f32 = 128, 8, 4
    feats = 2 * bb * _round_up(L, sub) * _round_up(F, lane) * stream_itemsize  # dbl-buffered
    dec = 2 * _round_up(bb, sub) * _round_up(H, lane) * stream_itemsize
    # Wa / Ua single-buffered (grid-invariant); bias / va are small f32 rows.
    wts = (_round_up(F, sub) + _round_up(H, sub)) * _round_up(H, lane) * stream_itemsize
    wts += 2 * sub * _round_up(H, lane) * f32
    inter = 4 * bb * _round_up(L, sub) * _round_up(H, lane) * f32              # a1 / tanh temps
    outs = 2 * _round_up(bb, sub) * (_round_up(F, lane) + _round_up(L, lane)) * f32
    return feats + dec + wts + inter + outs


def _pick_batch_block(B, L, F, H, stream_itemsize):
    """Largest sublane-aligned divisor of B that (a) gives >= 2 grid steps (so the
    'parallel' axis can shard across TensorCores on v7x and the pipeline overlaps
    DMA with compute) and (b) keeps the feature tile ~<= 4 MiB and the whole
    working set comfortably inside this generation's VMEM."""
    phys = _physical_vmem_bytes()
    feat_budget = min(4 << 20, phys // 8)
    vmem_cap = int(0.4 * phys)

    candidates = [bb for bb in range(8, B // 2 + 1, 8) if B % bb == 0]
    if not candidates:
        return B  # B too small / not splittable into sublane-aligned blocks
    good = [bb for bb in candidates
            if bb * L * F * stream_itemsize <= feat_budget
            and _tile_footprint_bytes(bb, L, F, H, stream_itemsize) <= vmem_cap]
    return max(good) if good else min(candidates)


def bahdanau_kernel(feat_ref, dec_ref, wa_ref, ua_ref, bias_ref, va_ref,
                    ctx_ref, attw_ref):
    bb, L, F = feat_ref.shape
    H = ua_ref.shape[0]

    feats = feat_ref[...]                                        # (bb, L, F), stream dtype

    # atten_1 = W_a(features): one fused (bb*L, F) @ (F, H) MXU pass.
    # (The reshape is a free sublane relabel when L % 8 == 0, as in the tests.)
    a1 = jnp.dot(feats.reshape(bb * L, F), wa_ref[...],
                 preferred_element_type=jnp.float32).reshape(bb, L, H)

    # atten_2 = U_a(decoder_hidden) + (ba + bu): one (bb, H) @ (H, H) MXU pass.
    a2 = jnp.dot(dec_ref[...], ua_ref[...],
                 preferred_element_type=jnp.float32) + bias_ref[...]   # (bb, H) f32

    atten_tan = jnp.tanh(a1 + a2[:, None, :])                    # (bb, L, H) f32 (EUP)

    # atten_score = v_a(atten_tan): VPU multiply + lane reduce over H instead of an
    # N=1 MXU matmul. v_a's bias is dropped (softmax over L is shift-invariant).
    score = jnp.sum(atten_tan * va_ref[...], axis=-1)            # (bb, L) f32

    # Softmax over L with L on the lane axis (lane reductions, lane-dense store).
    m = jnp.max(score, axis=-1, keepdims=True)                   # (bb, 1)
    e = jnp.exp(score - m)                                       # (bb, L)
    denom = jnp.sum(e, axis=-1, keepdims=True)                   # (bb, 1), >= 1
    inv = pl.reciprocal(denom, approx=True)                      # EUP slot
    inv = inv * (2.0 - denom * inv)                              # one Newton refine
    w = e * inv                                                  # (bb, L) f32

    attw_ref[...] = w

    # context = sum_L(atten_weight * features) as a batched (1, L) @ (L, F) MXU
    # contraction -- no (bb, L, F) broadcast product is ever materialized.
    ctx = jnp.einsum('bql,blf->bqf', w[:, None, :].astype(feats.dtype), feats,
                     preferred_element_type=jnp.float32)         # (bb, 1, F) f32
    ctx_ref[...] = ctx[:, 0, :]


def bahdanau_attention(features, decoder_hidden, Wa, ba, Ua, bu, va, bv,
                       *, batch_block=None, stream_dtype=None):
    """features: (B, L, F); decoder_hidden: (B, H).
    Wa:(F,H) ba:(1,H) Ua:(H,H) bu:(1,H) va:(H,1) bv:(1,1), weights stored (in, out).
    stream_dtype: optional narrower dtype (e.g. jnp.bfloat16) used only for the
    HBM streams / MXU inputs; softmax and accumulations stay f32.
    Returns (context (B, F), atten_weight (B, L))."""
    B, L, F = features.shape
    H = Ua.shape[0]

    if stream_dtype is not None:
        features = features.astype(stream_dtype)
        decoder_hidden = decoder_hidden.astype(stream_dtype)
        Wa = Wa.astype(stream_dtype)
        Ua = Ua.astype(stream_dtype)
    itemsize = jnp.dtype(features.dtype).itemsize

    if batch_block is None:
        batch_block = _pick_batch_block(B, L, F, H, itemsize)
    assert B % batch_block == 0
    # Sub-batch blocks must stay sublane-aligned on the second-minor dim of the
    # 2-D operands (decoder_hidden / context / atten_weight).
    assert batch_block == B or batch_block % 8 == 0
    num_blocks = B // batch_block

    # Fold the two hidden-space biases into one f32 row; drop bv (softmax is
    # shift-invariant so it cannot change either output). Keep bias/va in f32.
    bias = (ba + bu).reshape(1, H).astype(jnp.float32)
    va_row = va.reshape(1, H).astype(jnp.float32)

    # Explicit VMEM budget derived from the actual tile footprint (the scoped
    # defaults -- 16 MiB v5e / 32 MiB v6e,v7x -- would otherwise reject large
    # feature tiles long before physical VMEM is full).
    vmem_limit = int(min(_physical_vmem_bytes() - (8 << 20),
                         max(32 << 20,
                             2 * _tile_footprint_bytes(batch_block, L, F, H, itemsize))))

    def _run(single_buffer_invariants):
        inv = ({"pipeline_mode": pl.Buffered(1)}
               if single_buffer_invariants else {})
        return pl.pallas_call(
            bahdanau_kernel,
            out_shape=(
                jax.ShapeDtypeStruct((B, F), jnp.float32),
                jax.ShapeDtypeStruct((B, L), jnp.float32),
            ),
            grid_spec=pltpu.PrefetchScalarGridSpec(
                num_scalar_prefetch=0,
                grid=(num_blocks,),
                in_specs=[
                    pl.BlockSpec((batch_block, L, F), lambda i: (i, 0, 0)),  # features
                    pl.BlockSpec((batch_block, H), lambda i: (i, 0)),        # decoder hidden
                    pl.BlockSpec((F, H), lambda i: (0, 0), **inv),           # W_a weight (in,out)
                    pl.BlockSpec((H, H), lambda i: (0, 0), **inv),           # U_a weight (in,out)
                    pl.BlockSpec((1, H), lambda i: (0, 0), **inv),           # ba + bu (f32)
                    pl.BlockSpec((1, H), lambda i: (0, 0), **inv),           # v_a weight row (f32)
                ],
                out_specs=[
                    pl.BlockSpec((batch_block, F), lambda i: (i, 0)),        # context
                    pl.BlockSpec((batch_block, L), lambda i: (i, 0)),        # atten_weight
                ],
            ),
            compiler_params=pltpu.CompilerParams(
                dimension_semantics=("parallel",),
                vmem_limit_bytes=vmem_limit),
        )(features, decoder_hidden, Wa, Ua, bias, va_row)

    try:
        ctx, attw = _run(True)
    except Exception:
        # pipeline_mode=pl.Buffered(1) unsupported on this jax build: fall back to
        # default double-buffering of the (small) grid-invariant weights.
        ctx, attw = _run(False)

    return ctx, attw


def bahdanau_reference(features, decoder_hidden, Wa, ba, Ua, bu, va, bv):
    a1 = features @ Wa + ba                                # (B, L, H)
    a2 = (decoder_hidden @ Ua + bu)[:, None, :]            # (B, 1, H)
    t = jnp.tanh(a1 + a2)                                  # (B, L, H)
    score = t @ va + bv                                    # (B, L, 1)
    w = jax.nn.softmax(score, axis=1)                      # (B, L, 1)
    context = jnp.sum(w * features, axis=1)                # (B, F)
    return context, w[:, :, 0]


def _make_inputs(B, L, F, H, seed=0):
    key = jax.random.PRNGKey(seed)
    kf, kd, k1, k2, k3, k4, k5, k6 = jax.random.split(key, 8)
    features = jax.random.normal(kf, (B, L, F), dtype=jnp.float32)
    decoder_hidden = jax.random.normal(kd, (B, H), dtype=jnp.float32)
    # Parameter shapes follow nn.Linear in the module (stored as weight.T).
    Wa = 0.1 * jax.random.normal(k1, (F, H), dtype=jnp.float32)   # W_a.weight.T
    ba = 0.1 * jax.random.normal(k2, (1, H), dtype=jnp.float32)   # W_a.bias
    Ua = 0.1 * jax.random.normal(k3, (H, H), dtype=jnp.float32)   # U_a.weight.T
    bu = 0.1 * jax.random.normal(k4, (1, H), dtype=jnp.float32)   # U_a.bias
    va = 0.1 * jax.random.normal(k5, (H, 1), dtype=jnp.float32)   # v_a.weight.T
    bv = 0.1 * jax.random.normal(k6, (1, 1), dtype=jnp.float32)   # v_a.bias
    return features, decoder_hidden, Wa, ba, Ua, bu, va, bv


if __name__ == "__main__":
    # 1) Small module-like shapes (B=2): B is too small to split, so a single grid
    #    step is used; full-precision f32 path, tight tolerance.
    args = _make_inputs(2, 8, 32, 32, seed=0)
    ctx, attw = bahdanau_attention(*args)
    jax.block_until_ready((ctx, attw))
    ctx_r, attw_r = bahdanau_reference(*args)
    assert ctx.shape == (2, 32) and attw.shape == (2, 8)
    assert jnp.allclose(ctx, ctx_r, atol=1e-4, rtol=1e-4)
    assert jnp.allclose(attw, attw_r, atol=1e-4, rtol=1e-4)

    # 2) Batch large enough to split: exercises the multi-block "parallel" grid
    #    (>= 2 steps -> TensorCore sharding on v7x + DMA/compute overlap), f32.
    args32 = _make_inputs(32, 8, 32, 32, seed=1)
    ctx, attw = bahdanau_attention(*args32)
    jax.block_until_ready((ctx, attw))
    ctx_r, attw_r = bahdanau_reference(*args32)
    assert ctx.shape == (32, 32) and attw.shape == (32, 8)
    assert jnp.allclose(ctx, ctx_r, atol=1e-4, rtol=1e-4)
    assert jnp.allclose(attw, attw_r, atol=1e-4, rtol=1e-4)

    # 3) Same shapes with bf16 streaming of features/hidden/Wa/Ua (memory-bound
    #    production configuration); softmax/accumulation remain f32 in the kernel,
    #    so only bf16-input rounding is visible (looser tolerance).
    ctx16, attw16 = bahdanau_attention(*args32, stream_dtype=jnp.bfloat16)
    jax.block_until_ready((ctx16, attw16))
    assert jnp.allclose(ctx16, ctx_r, atol=5e-2, rtol=5e-2)
    assert jnp.allclose(attw16, attw_r, atol=5e-2, rtol=5e-2)

    print("KERNEL_OK")
</pallas_src>

<mosaic_0001>
module attributes {stable_mosaic.version = 11 : i64} {
  func.func @bahdanau_kernel(%arg0: i32, %arg1: memref<2x8x32xf32, #tpu.memory_space<vmem>>, %arg2: memref<2x32xf32, #tpu.memory_space<vmem>>, %arg3: memref<32x32xf32, #tpu.memory_space<vmem>>, %arg4: memref<32x32xf32, #tpu.memory_space<vmem>>, %arg5: memref<1x32xf32, #tpu.memory_space<vmem>>, %arg6: memref<1x32xf32, #tpu.memory_space<vmem>>, %arg7: memref<2x32xf32, #tpu.memory_space<vmem>>, %arg8: memref<2x8xf32, #tpu.memory_space<vmem>>) attributes {dimension_semantics = [#tpu.dimension_semantics<parallel>], iteration_bounds = array<i64: 1>, scalar_prefetch = 0 : i64, scratch_operands = 0 : i64, tpu.core_type = #tpu.core_type<tc>, window_params = [{transform_indices = @transform_0, window_bounds = array<i64: 2, 8, 32>}, {transform_indices = @transform_1, window_bounds = array<i64: 2, 32>}, {pipeline_mode = #tpu.pipeline_mode<synchronous>, transform_indices = @transform_2, window_bounds = array<i64: 32, 32>}, {pipeline_mode = #tpu.pipeline_mode<synchronous>, transform_indices = @transform_3, window_bounds = array<i64: 32, 32>}, {pipeline_mode = #tpu.pipeline_mode<synchronous>, transform_indices = @transform_4, window_bounds = array<i64: 1, 32>}, {pipeline_mode = #tpu.pipeline_mode<synchronous>, transform_indices = @transform_5, window_bounds = array<i64: 1, 32>}, {transform_indices = @transform_6, window_bounds = array<i64: 2, 32>}, {transform_indices = @transform_7, window_bounds = array<i64: 2, 8>}]} {
    %c0 = arith.constant 0 : index
    %c0_0 = arith.constant 0 : index
    %c0_1 = arith.constant 0 : index
    %0 = vector.load %arg1[%c0, %c0_0, %c0_1] : memref<2x8x32xf32, #tpu.memory_space<vmem>>, vector<2x8x32xf32>
    %1 = vector.shape_cast %0 : vector<2x8x32xf32> to vector<16x32xf32>
    %c0_2 = arith.constant 0 : index
    %c0_3 = arith.constant 0 : index
    %2 = vector.load %arg3[%c0_2, %c0_3] : memref<32x32xf32, #tpu.memory_space<vmem>>, vector<32x32xf32>
    %cst = arith.constant dense<0.000000e+00> : vector<16x32xf32>
    %3 = tpu.matmul %1, %2, %cst {dimension_numbers = #tpu.dot_dimension_numbers<[1], [0], [0], [1], [0, 0, 1, 1], [], []>} : vector<16x32xf32>, vector<32x32xf32>, vector<16x32xf32> -> vector<16x32xf32>
    %4 = vector.shape_cast %3 : vector<16x32xf32> to vector<2x8x32xf32>
    %c0_4 = arith.constant 0 : index
    %c0_5 = arith.constant 0 : index
    %5 = vector.load %arg2[%c0_4, %c0_5] : memref<2x32xf32, #tpu.memory_space<vmem>>, vector<2x32xf32>
    %c0_6 = arith.constant 0 : index
    %c0_7 = arith.constant 0 : index
    %6 = vector.load %arg4[%c0_6, %c0_7] : memref<32x32xf32, #tpu.memory_space<vmem>>, vector<32x32xf32>
    %cst_8 = arith.constant dense<0.000000e+00> : vector<2x32xf32>
    %7 = tpu.matmul %5, %6, %cst_8 {dimension_numbers = #tpu.dot_dimension_numbers<[1], [0], [0], [1], [0, 0, 1, 1], [], []>} : vector<2x32xf32>, vector<32x32xf32>, vector<2x32xf32> -> vector<2x32xf32>
    %c0_9 = arith.constant 0 : index
    %c0_10 = arith.constant 0 : index
    %8 = vector.load %arg5[%c0_9, %c0_10] : memref<1x32xf32, #tpu.memory_space<vmem>>, vector<1x32xf32>
    %9 = vector.broadcast %8 : vector<1x32xf32> to vector<2x32xf32>
    %10 = arith.addf %7, %9 : vector<2x32xf32>
    %11 = vector.shape_cast %10 : vector<2x32xf32> to vector<2x1x32xf32>
    %12 = vector.broadcast %11 : vector<2x1x32xf32> to vector<2x8x32xf32>
    %13 = arith.addf %4, %12 : vector<2x8x32xf32>
    %14 = math.tanh %13 : vector<2x8x32xf32>
    %c0_11 = arith.constant 0 : index
    %c0_12 = arith.constant 0 : index
    %15 = vector.load %arg6[%c0_11, %c0_12] : memref<1x32xf32, #tpu.memory_space<vmem>>, vector<1x32xf32>
    %16 = vector.shape_cast %15 : vector<1x32xf32> to vector<1x1x32xf32>
    %17 = vector.broadcast %16 : vector<1x1x32xf32> to vector<2x8x32xf32>
    %18 = arith.mulf %14, %17 : vector<2x8x32xf32>
    %cst_13 = arith.constant dense<0.000000e+00> : vector<2x8xf32>
    %19 = vector.multi_reduction <add>, %18, %cst_13 [2] : vector<2x8x32xf32> to vector<2x8xf32>
    %cst_14 = arith.constant dense<0xFF800000> : vector<2xf32>
    %20 = vector.multi_reduction <maximumf>, %19, %cst_14 [1] : vector<2x8xf32> to vector<2xf32>
    %21 = vector.shape_cast %20 : vector<2xf32> to vector<2x1xf32>
    %22 = vector.broadcast %21 : vector<2x1xf32> to vector<2x8xf32>
    %23 = arith.subf %19, %22 : vector<2x8xf32>
    %24 = math.exp %23 : vector<2x8xf32>
    %cst_15 = arith.constant dense<0.000000e+00> : vector<2xf32>
    %25 = vector.multi_reduction <add>, %24, %cst_15 [1] : vector<2x8xf32> to vector<2xf32>
    %26 = vector.shape_cast %25 : vector<2xf32> to vector<2x1xf32>
    %27 = tpu.reciprocal %26 {approx = true} : vector<2x1xf32> -> vector<2x1xf32>
    %28 = arith.mulf %26, %27 : vector<2x1xf32>
    %cst_16 = arith.constant 2.000000e+00 : f32
    %29 = vector.broadcast %cst_16 : f32 to vector<2x1xf32>
    %30 = arith.subf %29, %28 : vector<2x1xf32>
    %31 = arith.mulf %27, %30 : vector<2x1xf32>
    %32 = vector.broadcast %31 : vector<2x1xf32> to vector<2x8xf32>
    %33 = arith.mulf %24, %32 : vector<2x8xf32>
    %c0_17 = arith.constant 0 : index
    %c0_18 = arith.constant 0 : index
    %34 = vector.load %arg8[%c0_17, %c0_18] : memref<2x8xf32, #tpu.memory_space<vmem>>, vector<2x8xf32>
    tpu.vector_store %arg8[%c0_17, %c0_18], %33 {strides = array<i32>} : memref<2x8xf32, #tpu.memory_space<vmem>>, vector<2x8xf32>,
    %35 = vector.shape_cast %33 : vector<2x8xf32> to vector<2x1x8xf32>
    "tpu.trace_start"() <{level = 10 : i32, message = "bql,blf->bqf"}> : () -> ()
    %cst_19 = arith.constant dense<0.000000e+00> : vector<2x1x32xf32>
    %36 = tpu.matmul %35, %0, %cst_19 {dimension_numbers = #tpu.dot_dimension_numbers<[2], [1], [1], [2], [0, 0, 0, 1, 1, 2], [0], [0]>} : vector<2x1x8xf32>, vector<2x8x32xf32>, vector<2x1x32xf32> -> vector<2x1x32xf32>
    "tpu.trace_stop"() : () -> ()
    %37 = vector.shape_cast %36 : vector<2x1x32xf32> to vector<2x32xf32>
    %c0_20 = arith.constant 0 : index
    %c0_21 = arith.constant 0 : index
    %38 = vector.load %arg7[%c0_20, %c0_21] : memref<2x32xf32, #tpu.memory_space<vmem>>, vector<2x32xf32>
    tpu.vector_store %arg7[%c0_20, %c0_21], %37 {strides = array<i32>} : memref<2x32xf32, #tpu.memory_space<vmem>>, vector<2x32xf32>,
    return
  }
  func.func @transform_0(%arg0: i32) -> (i32, i32, i32) {
    %c0_i32 = arith.constant 0 : i32
    %c0_i32_0 = arith.constant 0 : i32
    %c0_i32_1 = arith.constant 0 : i32
    return %arg0, %c0_i32, %c0_i32_0 : i32, i32, i32
  }
  func.func @transform_1(%arg0: i32) -> (i32, i32) {
    %c0_i32 = arith.constant 0 : i32
    %c0_i32_0 = arith.constant 0 : i32
    return %arg0, %c0_i32 : i32, i32
  }
  func.func @transform_2(%arg0: i32) -> (i32, i32) {
    %c0_i32 = arith.constant 0 : i32
    %c0_i32_0 = arith.constant 0 : i32
    %c0_i32_1 = arith.constant 0 : i32
    return %c0_i32, %c0_i32_0 : i32, i32
  }
  func.func @transform_3(%arg0: i32) -> (i32, i32) {
    %c0_i32 = arith.constant 0 : i32
    %c0_i32_0 = arith.constant 0 : i32
    %c0_i32_1 = arith.constant 0 : i32
    return %c0_i32, %c0_i32_0 : i32, i32
  }
  func.func @transform_4(%arg0: i32) -> (i32, i32) {
    %c0_i32 = arith.constant 0 : i32
    %c0_i32_0 = arith.constant 0 : i32
    %c0_i32_1 = arith.constant 0 : i32
    return %c0_i32, %c0_i32_0 : i32, i32
  }
  func.func @transform_5(%arg0: i32) -> (i32, i32) {
    %c0_i32 = arith.constant 0 : i32
    %c0_i32_0 = arith.constant 0 : i32
    %c0_i32_1 = arith.constant 0 : i32
    return %c0_i32, %c0_i32_0 : i32, i32
  }
  func.func @transform_6(%arg0: i32) -> (i32, i32) {
    %c0_i32 = arith.constant 0 : i32
    %c0_i32_0 = arith.constant 0 : i32
    return %arg0, %c0_i32 : i32, i32
  }
  func.func @transform_7(%arg0: i32) -> (i32, i32) {
    %c0_i32 = arith.constant 0 : i32
    %c0_i32_0 = arith.constant 0 : i32
    return %arg0, %c0_i32 : i32, i32
  }
}

module attributes {stable_mosaic.version = 11 : i64} {
  func.func @bahdanau_kernel(%arg0: i32, %arg1: memref<2x8x32xf32, #tpu.memory_space<vmem>>, %arg2: memref<2x32xf32, #tpu.memory_space<vmem>>, %arg3: memref<32x32xf32, #tpu.memory_space<vmem>>, %arg4: memref<32x32xf32, #tpu.memory_space<vmem>>, %arg5: memref<1x32xf32, #tpu.memory_space<vmem>>, %arg6: memref<1x32xf32, #tpu.memory_space<vmem>>, %arg7: memref<2x32xf32, #tpu.memory_space<vmem>>, %arg8: memref<2x8xf32, #tpu.memory_space<vmem>>) attributes {dimension_semantics = [#tpu.dimension_semantics<parallel>], iteration_bounds = array<i64: 1>, scalar_prefetch = 0 : i64, scratch_operands = 0 : i64, tpu.core_type = #tpu.core_type<tc>, window_params = [{transform_indices = @transform_0, window_bounds = array<i64: 2, 8, 32>}, {transform_indices = @transform_1, window_bounds = array<i64: 2, 32>}, {pipeline_mode = #tpu.pipeline_mode<synchronous>, transform_indices = @transform_2, window_bounds = array<i64: 32, 32>}, {pipeline_mode = #tpu.pipeline_mode<synchronous>, transform_indices = @transform_3, window_bounds = array<i64: 32, 32>}, {pipeline_mode = #tpu.pipeline_mode<synchronous>, transform_indices = @transform_4, window_bounds = array<i64: 1, 32>}, {pipeline_mode = #tpu.pipeline_mode<synchronous>, transform_indices = @transform_5, window_bounds = array<i64: 1, 32>}, {transform_indices = @transform_6, window_bounds = array<i64: 2, 32>}, {transform_indices = @transform_7, window_bounds = array<i64: 2, 8>}]} {
    %c0 = arith.constant 0 : index
    %c0_0 = arith.constant 0 : index
    %c0_1 = arith.constant 0 : index
    %0 = vector.load %arg1[%c0, %c0_0, %c0_1] : memref<2x8x32xf32, #tpu.memory_space<vmem>>, vector<2x8x32xf32>
    %1 = vector.shape_cast %0 : vector<2x8x32xf32> to vector<16x32xf32>
    %c0_2 = arith.constant 0 : index
    %c0_3 = arith.constant 0 : index
    %2 = vector.load %arg3[%c0_2, %c0_3] : memref<32x32xf32, #tpu.memory_space<vmem>>, vector<32x32xf32>
    %cst = arith.constant dense<0.000000e+00> : vector<16x32xf32>
    %3 = tpu.matmul %1, %2, %cst {dimension_numbers = #tpu.dot_dimension_numbers<[1], [0], [0], [1], [0, 0, 1, 1], [], []>} : vector<16x32xf32>, vector<32x32xf32>, vector<16x32xf32> -> vector<16x32xf32>
    %4 = vector.shape_cast %3 : vector<16x32xf32> to vector<2x8x32xf32>
    %c0_4 = arith.constant 0 : index
    %c0_5 = arith.constant 0 : index
    %5 = vector.load %arg2[%c0_4, %c0_5] : memref<2x32xf32, #tpu.memory_space<vmem>>, vector<2x32xf32>
    %c0_6 = arith.constant 0 : index
    %c0_7 = arith.constant 0 : index
    %6 = vector.load %arg4[%c0_6, %c0_7] : memref<32x32xf32, #tpu.memory_space<vmem>>, vector<32x32xf32>
    %cst_8 = arith.constant dense<0.000000e+00> : vector<2x32xf32>
    %7 = tpu.matmul %5, %6, %cst_8 {dimension_numbers = #tpu.dot_dimension_numbers<[1], [0], [0], [1], [0, 0, 1, 1], [], []>} : vector<2x32xf32>, vector<32x32xf32>, vector<2x32xf32> -> vector<2x32xf32>
    %c0_9 = arith.constant 0 : index
    %c0_10 = arith.constant 0 : index
    %8 = vector.load %arg5[%c0_9, %c0_10] : memref<1x32xf32, #tpu.memory_space<vmem>>, vector<1x32xf32>
    %9 = vector.broadcast %8 : vector<1x32xf32> to vector<2x32xf32>
    %10 = arith.addf %7, %9 : vector<2x32xf32>
    %11 = vector.shape_cast %10 : vector<2x32xf32> to vector<2x1x32xf32>
    %12 = vector.broadcast %11 : vector<2x1x32xf32> to vector<2x8x32xf32>
    %13 = arith.addf %4, %12 : vector<2x8x32xf32>
    %14 = math.tanh %13 : vector<2x8x32xf32>
    %c0_11 = arith.constant 0 : index
    %c0_12 = arith.constant 0 : index
    %15 = vector.load %arg6[%c0_11, %c0_12] : memref<1x32xf32, #tpu.memory_space<vmem>>, vector<1x32xf32>
    %16 = vector.shape_cast %15 : vector<1x32xf32> to vector<1x1x32xf32>
    %17 = vector.broadcast %16 : vector<1x1x32xf32> to vector<2x8x32xf32>
    %18 = arith.mulf %14, %17 : vector<2x8x32xf32>
    %cst_13 = arith.constant dense<0.000000e+00> : vector<2x8xf32>
    %19 = vector.multi_reduction <add>, %18, %cst_13 [2] : vector<2x8x32xf32> to vector<2x8xf32>
    %cst_14 = arith.constant dense<0xFF800000> : vector<2xf32>
    %20 = vector.multi_reduction <maximumf>, %19, %cst_14 [1] : vector<2x8xf32> to vector<2xf32>
    %21 = vector.shape_cast %20 : vector<2xf32> to vector<2x1xf32>
    %22 = vector.broadcast %21 : vector<2x1xf32> to vector<2x8xf32>
    %23 = arith.subf %19, %22 : vector<2x8xf32>
    %24 = math.exp %23 : vector<2x8xf32>
    %cst_15 = arith.constant dense<0.000000e+00> : vector<2xf32>
    %25 = vector.multi_reduction <add>, %24, %cst_15 [1] : vector<2x8xf32> to vector<2xf32>
    %26 = vector.shape_cast %25 : vector<2xf32> to vector<2x1xf32>
    %27 = tpu.reciprocal %26 {approx = true} : vector<2x1xf32> -> vector<2x1xf32>
    %28 = arith.mulf %26, %27 : vector<2x1xf32>
    %cst_16 = arith.constant 2.000000e+00 : f32
    %29 = vector.broadcast %cst_16 : f32 to vector<2x1xf32>
    %30 = arith.subf %29, %28 : vector<2x1xf32>
    %31 = arith.mulf %27, %30 : vector<2x1xf32>
    %32 = vector.broadcast %31 : vector<2x1xf32> to vector<2x8xf32>
    %33 = arith.mulf %24, %32 : vector<2x8xf32>
    %c0_17 = arith.constant 0 : index
    %c0_18 = arith.constant 0 : index
    %34 = vector.load %arg8[%c0_17, %c0_18] : memref<2x8xf32, #tpu.memory_space<vmem>>, vector<2x8xf32>
    tpu.vector_store %arg8[%c0_17, %c0_18], %33 {strides = array<i32>} : memref<2x8xf32, #tpu.memory_space<vmem>>, vector<2x8xf32>,
    %35 = vector.shape_cast %33 : vector<2x8xf32> to vector<2x1x8xf32>
    "tpu.trace_start"() <{level = 10 : i32, message = "bql,blf->bqf"}> : () -> ()
    %cst_19 = arith.constant dense<0.000000e+00> : vector<2x1x32xf32>
    %36 = tpu.matmul %35, %0, %cst_19 {dimension_numbers = #tpu.dot_dimension_numbers<[2], [1], [1], [2], [0, 0, 0, 1, 1, 2], [0], [0]>} : vector<2x1x8xf32>, vector<2x8x32xf32>, vector<2x1x32xf32> -> vector<2x1x32xf32>
    "tpu.trace_stop"() : () -> ()
    %37 = vector.shape_cast %36 : vector<2x1x32xf32> to vector<2x32xf32>
    %c0_20 = arith.constant 0 : index
    %c0_21 = arith.constant 0 : index
    %38 = vector.load %arg7[%c0_20, %c0_21] : memref<2x32xf32, #tpu.memory_space<vmem>>, vector<2x32xf32>
    tpu.vector_store %arg7[%c0_20, %c0_21], %37 {strides = array<i32>} : memref<2x32xf32, #tpu.memory_space<vmem>>, vector<2x32xf32>,
    return
  }
  func.func @transform_0(%arg0: i32) -> (i32, i32, i32) {
    %c0_i32 = arith.constant 0 : i32
    %c0_i32_0 = arith.constant 0 : i32
    %c0_i32_1 = arith.constant 0 : i32
    return %arg0, %c0_i32, %c0_i32_0 : i32, i32, i32
  }
  func.func @transform_1(%arg0: i32) -> (i32, i32) {
    %c0_i32 = arith.constant 0 : i32
    %c0_i32_0 = arith.constant 0 : i32
    return %arg0, %c0_i32 : i32, i32
  }
  func.func @transform_2(%arg0: i32) -> (i32, i32) {
    %c0_i32 = arith.constant 0 : i32
    %c0_i32_0 = arith.constant 0 : i32
    %c0_i32_1 = arith.constant 0 : i32
    return %c0_i32, %c0_i32_0 : i32, i32
  }
  func.func @transform_3(%arg0: i32) -> (i32, i32) {
    %c0_i32 = arith.constant 0 : i32
    %c0_i32_0 = arith.constant 0 : i32
    %c0_i32_1 = arith.constant 0 : i32
    return %c0_i32, %c0_i32_0 : i32, i32
  }
  func.func @transform_4(%arg0: i32) -> (i32, i32) {
    %c0_i32 = arith.constant 0 : i32
    %c0_i32_0 = arith.constant 0 : i32
    %c0_i32_1 = arith.constant 0 : i32
    return %c0_i32, %c0_i32_0 : i32, i32
  }
  func.func @transform_5(%arg0: i32) -> (i32, i32) {
    %c0_i32 = arith.constant 0 : i32
    %c0_i32_0 = arith.constant 0 : i32
    %c0_i32_1 = arith.constant 0 : i32
    return %c0_i32, %c0_i32_0 : i32, i32
  }
  func.func @transform_6(%arg0: i32) -> (i32, i32) {
    %c0_i32 = arith.constant 0 : i32
    %c0_i32_0 = arith.constant 0 : i32
    return %arg0, %c0_i32 : i32, i32
  }
  func.func @transform_7(%arg0: i32) -> (i32, i32) {
    %c0_i32 = arith.constant 0 : i32
    %c0_i32_0 = arith.constant 0 : i32
    return %arg0, %c0_i32 : i32, i32
  }
}

</mosaic_0001>

<bundles_post_ra>
// kernel: tpu_custom_call.1
= control target key start
LH: loop header
LB: loop body
LE: loop exit
PB: predicated region body
PF: predicated region fallthrough
CT: control target
= control target key end

     0   :  { %13 = vsyncpa [#allocation3], 0  ;;  %s942_s0 = inlined_call_operand.hbm [shape: f32[2,8,32], index: 0, kind: input, shape index: {}]   ;;  %s943_s1 = inlined_call_operand.vmem [shape: f32[2,32], index: 1, kind: input, shape index: {}]   ;;  %s944_s2 = inlined_call_operand.hbm [shape: f32[32,32], index: 2, kind: input, shape index: {}]   ;;  %s945_s3 = inlined_call_operand.hbm [shape: f32[32,32], index: 3, kind: input, shape index: {}]   ;;  %s946_s4 = inlined_call_operand.vmem [shape: f32[1,32], index: 4, kind: input, shape index: {}]   ;;  %s947_s5 = inlined_call_operand.vmem [shape: f32[1,32], index: 5, kind: input, shape index: {}]   ;;  %s948_s6 = inlined_call_operand.hbm [shape: f32[2,32], index: 6, kind: output, shape index: {0}]   ;;  %s949_s7 = inlined_call_operand.hbm [shape: f32[2,8], index: 7, kind: output, shape index: {1}]  }
   0x1   :  { %14 = vsyncpa [#allocation6], 0 }
   0x2   :  { %15 = vsyncpa [#allocation4], 0 }
   0x3   :  { %16 = vsyncpa [#allocation10], 0  ;;  %s778_s24 = smov [#allocation5]   ;;  %s779_s26 = smov [#allocation2]  }
   0x4   :  { %s36_s25 = sshll.u32 %s778_s24, 4  ;;  %s22_s27 = sshll.u32 %s779_s26, 4  ;;  %s37_s25 = int_to_ptr.vmem [resolvable:$true] %s36_s25  ;;  %s830_s27 = int_to_ptr.vmem [resolvable:$true] %s22_s27 }
   0x5   :  { %s660_s30 = scalar_lea.hbm %s944_s2, 512 }
   0x6   :  { %p661_p0 = scmp.ne.s32.totalorder %s944_s2, %s660_s30  ;;  %p664_p1 = scmp.lt.u32.totalorder %s660_s30, %s944_s2 }
   0x8   :  { %p666_p2 = pnand %p664_p1, %p661_p0 }
   0xa   :  { %669 = shalt.err (!%p666_p2)
}
   0xb   :  { %s670_s12 = scalar_lea.vmem %s37_s25, 512  ;;  %p675_p4 = scmp.lt.s32.totalorder %s37_s25, %s37_s25 }
   0xc   :  { %p671_p3 = scmp.ne.s32.totalorder %s37_s25, %s670_s12  ;;  %p676_p5 = scmp.lt.s32.totalorder %s670_s12, %s670_s12 }
   0xe   :  { %p677_p6 = por %p676_p5, %p675_p4 }
  0x10   :  { %p678_p7 = pnand %p677_p6, %p671_p3 }
  0x12   :  { %681 = shalt.err (!%p678_p7)
}
  0x13   :  { %s780_s13 = smov 128   ;;  %s781_s14 = smov 8  }
  0x14   :  { %42 = dma.hbm_to_vmem [thread:$0]  %s944_s2, 512, %s37_s25, [#allocation6], %s780_s13, %s780_s13, %s781_s14  }
  0x15   :  { %s682_s19 = scalar_lea.hbm %s942_s0, 256 }
  0x16   :  { %p683_p8 = scmp.ne.s32.totalorder %s942_s0, %s682_s19  ;;  %p686_p9 = scmp.lt.u32.totalorder %s682_s19, %s942_s0 }
  0x18   :  { %p688_p10 = pnand %p686_p9, %p683_p8 }
  0x1a   :  { %691 = shalt.err (!%p688_p10)
}
  0x1b   :  { %s692_s24 = scalar_lea.vmem %s830_s27, 256  ;;  %p697_p12 = scmp.lt.s32.totalorder %s830_s27, %s830_s27 }
  0x1c   :  { %p693_p11 = scmp.ne.s32.totalorder %s830_s27, %s692_s24  ;;  %p698_p13 = scmp.lt.s32.totalorder %s692_s24, %s692_s24 }
  0x1e   :  { %p699_p0 = por %p698_p13, %p697_p12 }
  0x20   :  { %p700_p1 = pnand %p699_p0, %p693_p11 }
  0x22   :  { %703 = shalt.err (!%p700_p1)
}
  0x23   :  { %28 = dma.hbm_to_vmem [thread:$0]  %s942_s0, 256, %s830_s27, [#allocation3], %s780_s13, %s780_s13, %s781_s14  }
  0x24   :  { %s782_s26 = smov [#allocation7]   ;;  %s704_s8 = scalar_lea.hbm %s945_s3, 512 }
  0x25   :  { %s48_s28 = sshll.u32 %s782_s26, 4  ;;  %p705_p2 = scmp.ne.s32.totalorder %s945_s3, %s704_s8  ;;  %s49_s28 = int_to_ptr.vmem [resolvable:$true] %s48_s28 }
  0x26   :  { %p708_p3 = scmp.lt.u32.totalorder %s704_s8, %s945_s3 }
  0x28   :  { %p710_p4 = pnand %p708_p3, %p705_p2 }
  0x2a   :  { %713 = shalt.err (!%p710_p4)
}
  0x2b   :  { %s714_s15 = scalar_lea.vmem %s49_s28, 512  ;;  %p719_p6 = scmp.lt.s32.totalorder %s49_s28, %s49_s28 }
  0x2c   :  { %p715_p5 = scmp.ne.s32.totalorder %s49_s28, %s714_s15  ;;  %p720_p7 = scmp.lt.s32.totalorder %s714_s15, %s714_s15 }
  0x2e   :  { %p721_p8 = por %p720_p7, %p719_p6 }
  0x30   :  { %p722_p9 = pnand %p721_p8, %p715_p5 }
  0x32   :  { %725 = shalt.err (!%p722_p9)
}
  0x33   :  { %54 = dma.hbm_to_vmem [thread:$0]  %s945_s3, 512, %s49_s28, [#allocation6], %s780_s13, %s780_s13, %s781_s14  }
  0x34   :  { %770 = dma.done.wait [#allocation3], 256  }
  0x35   :  { %771 = vsyncadd [#allocation3], 4294967040 }
  0x36   :  { %772 = dma.done.wait [#allocation6], 1024  }
  0x37   :  { %773 = vsyncadd [#allocation6], 4294966272  ;;  %v783_v0 = vmov 0.0|0.0   ;;  %vm784_vm0 = vmmov 0   ;;  %v785_v1 = vmov 0.0   ;;  %v157_v2 = vld [vmem:[#allocation7] sm:$0xff]  ;;  %v245_v19 = vlaneseq }
  0x38   :  { %630 = vmatprep.subr.bf16.mxu1 %v783_v0  ;;  %609 = vmatprep.mubr.msk.f32.mxu1 %vm784_vm0, %v785_v1  ;;  %v158_v3 = vld [vmem:[#allocation7 + $0x8] sm:$0xff]  ;;  %v159_v4 = vld [vmem:[#allocation7 + $0x10] sm:$0xff]  ;;  %v160_v6 = vld [vmem:[#allocation7 + $0x18] sm:$0xff]  ;;  %vm74_vm1 = vcmask 261120   ;;  %v786_v17 = vmov 1966171168  }
  0x39   :  { %v631_v5 = vpack.c.bf16 %v158_v3, %v157_v2  ;;  %v70_v7 = vld [vmem:[#allocation5] sm:$0xff]  ;;  %v71_v8 = vld [vmem:[#allocation5 + $0x8] sm:$0xff]  ;;  %v72_v10 = vld [vmem:[#allocation5 + $0x10] sm:$0xff]  ;;  %v634_v12 = vpack.c.bf16 %v160_v6, %v159_v4  ;;  %v243_v18 = vunpack.c.l.s4 %v786_v17  ;;  %v891_v21 = vshrl.u32 %v245_v19, 7 }
  0x3a   :  { %v622_v9 = vpack.c.bf16 %v71_v8, %v70_v7  ;;  %v73_v11 = vld [vmem:[#allocation5 + $0x18] sm:$0xff]  ;;  %v68_v14 = vld [vmem:[#allocation2] sm:$0xff]  ;;  %v296_v45 = vand.u32 127, %v245_v19  ;;  %vm305_vm2 = vcmask 1041409   ;;  %vm308_vm3 = vcmask 58368  }
  0x3b   :  { %632 = vmatpush3.bf16.msra.mxu1 %v631_v5  ;;  %v626_v13 = vpack.c.bf16 %v73_v11, %v72_v10  ;;  %598 = vmatprep.mubr.msk.f32.mxu0 %vm74_vm1, %v68_v14  ;;  %v156_v15 = vld [vmem:[%s943_s1] sm:$0x3]  ;;  %v69_v16 = vld [vmem:[#allocation2 + $0x8] sm:$0xff]  ;;  %v244_v20 = vunpack.c.0.s8 %v243_v18  ;;  %v898_v29 = vsub.s32 0, %v891_v21  ;;  %v787_v53 = vmov 0  }
  0x3c   :  { %633 = vmatprep.subr.bf16.mxu1 %v783_v0  ;;  %623 = vmatprep.subr.bf16.mxu0 %v622_v9  ;;  %v570_v22 = vld [vmem:[%s946_s4] ss:$0 sm:$0xff]  ;;  %v299_v47 = vsub.s32 %v296_v45, %v891_v21  ;;  %v319_v54 = vsub.s32 1, %v891_v21  ;;  %vm386_vm4 = vcmask 64512  }
  0x3d   :  { %625 = vmatpush3.bf16.msra.mxu0 %v622_v9  ;;  %v247_v23 = vsub.s32 %v244_v20, %v891_v21  ;;  %v572_v38 = vld [vmem:[%s947_s5] ss:$0 sm:$0xff]  ;;  %649 = vset.pattern.permute.xlu0 %v787_v53  ;;  %s788_s5 = smov [#allocation9]  }
  0x3e   :  { %627 = vmatprep.subr.bf16.mxu0 %v626_v13  ;;  %648 = vset.pattern.permute.xlu1 %v787_v53  ;;  %s554_s17 = sshll.u32 %s788_s5, 4  ;;  %s555_s17 = int_to_ptr.vmem [resolvable:$true] %s554_s17 }
  0x3f   :  { %635 = vmatpush3.bf16.msra.mxu1 %v634_v12  ;;  %s726_s18 = scalar_lea.vmem %s555_s17, 32  ;;  %p731_p11 = scmp.lt.s32.totalorder %s555_s17, %s555_s17 }
  0x40   :  { %617 = vmatprep.subr.mxu1 %v785_v1  ;;  %p727_p10 = scmp.ne.s32.totalorder %s555_s17, %s726_s18  ;;  %p732_p12 = scmp.lt.s32.totalorder %s726_s18, %s726_s18 }
  0x41   :  { %629 = vmatpush3.bf16.msra.mxu0 %v626_v13 }
  0x42   :  { %610 = vmatmul.mubr.msk.f32.vlgmr.msra.gmra.mrb[0].mxu1 %vm74_vm1, %v156_v15  ;;  %612 = vmatprep.subr.mxu0 %v785_v1  ;;  %p733_p13 = por %p732_p12, %p731_p11 }
  0x43   :  { %618 = vmatpush3.msra.mxu1 %v69_v16  ;;  %619 = vmatprep.mubr.msk.f32.mxu1 %vm784_vm0, %v785_v1 }
  0x44   :  { %599 = vmatmul.mubr.msk.f32.vlgmr.msra.gmra.mrb[0].mxu0 %vm74_vm1, %v69_v16  ;;  %p734_p0 = pnand %p733_p13, %p727_p10 }
  0x45   :  { %613 = vmatpush3.msra.mxu0 %v68_v14  ;;  %614 = vmatprep.mubr.msk.f32.mxu0 %vm784_vm0, %v785_v1 }
 0x115   :  { %v237_v24 = vpop.f32.mrb[0].mxu1 }
 0x116   :  { %v238_v25 = vadd.f32 %v570_v22, %v237_v24  ;;  %v611_v26 = vpop.f32.mrb[1].mxu1 }
 0x117   :  { %v600_v27 = vpop.f32.mrb[0].mxu0 }
 0x118   :  { %v248_v28 = vrot.slane %v238_v25, %v247_v23  ;;  %v147_v30 = vpop.f32.mrb[1].mxu0 }
 0x11a   :  { %v249_v31 = vcombine.high %v248_v28, %v248_v28  ;;  %v256_v32 = vrot.slane %v248_v28, %v247_v23 }
 0x11c   :  { %v263_v33 = vrot.slane %v249_v31, %v247_v23  ;;  %v267_v34 = vrot.slane %v256_v32, %v898_v29 }
 0x11e   :  { %v271_v35 = vrot.slane %v263_v33, %v898_v29  ;;  %v274_v36 = vadd.f32 %v267_v34, %v147_v30 }
 0x120   :  { %v275_v37 = vadd.f32 %v600_v27, %v271_v35  ;;  %650 = vtanh.f32 %v274_v36 }
 0x122   :  { %652 = vtanh.f32 %v275_v37 }
 0x12a   :  { %v651_v39 = vpop.eup %650 }
 0x12b   :  { %v285_v40 = vmul.f32 %v651_v39, %v572_v38 }
 0x12c   :  { %v653_v41 = vpop.eup %652 }
 0x12d   :  { %v287_v42 = vsel %vm74_vm1, %v285_v40, 0.0  ;;  %v286_v43 = vmul.f32 %v653_v41, %v572_v38 }
 0x12e   :  { %288 = vadd.xlane.f32.xlu0 %v287_v42 }
 0x12f   :  { %v290_v44 = vsel %vm74_vm1, %v286_v43, 0.0 }
 0x132   :  { %291 = vadd.xlane.f32.xlu0 %v290_v44 }
 0x1bb   :  { %v289_v46 = vpop.xlane.xlu0 %288 }
 0x1bc   :  { %v300_v49 = vrot.slane %v289_v46, %v299_v47 }
 0x1bf   :  { %v292_v48 = vpop.xlane.xlu0 %291 }
 0x1c0   :  { %v304_v50 = vrot.slane %v292_v48, %v299_v47 }
 0x1c2   :  { %v306_v51 = vsel %vm305_vm2, %v304_v50, %v300_v49 }
 0x1c3   :  { %v309_v52 = vsel %vm308_vm3, %v306_v51, -inf }
 0x1c4   :  { %310 = vmax.xlane.f32.xlu1 %v309_v52 }
 0x251   :  { %v311_v55 = vpop.xlane.xlu1 %310 }
 0x252   :  { %v316_v56 = vrot.slane %v311_v55, %v898_v29  ;;  %v320_v57 = vrot.slane %v311_v55, %v319_v54 }
 0x254   :  { %v323_v58 = vsub.f32 %v289_v46, %v316_v56  ;;  %v324_v59 = vsub.f32 %v292_v48, %v320_v57 }
 0x256   :  { %v325_v60 = vmul.f32 1.442695, %v323_v58  ;;  %v327_v61 = vmul.f32 1.442695, %v324_v59 }
 0x258   :  { %654 = vpow2.f32 %v325_v60 }
 0x259   :  { %656 = vpow2.f32 %v327_v61 }
 0x262   :  { %v655_v62 = vpop.eup %654 }
 0x263   :  { %v657_v63 = vpop.eup %656  ;;  %332 = vperm.xlu1 %648, %v655_v62  }
 0x264   :  { %335 = vperm.xlu0 %649, %v657_v63  }
 0x2e2   :  { %v333_v0 = vpop.permute.xlu1 %332 }
 0x2e3   :  { %v336_v1 = vpop.permute.xlu0 %335  ;;  %v340_v2 = vrot.slane %v333_v0, %v299_v47 }
 0x2e4   :  { %v344_v3 = vrot.slane %v336_v1, %v299_v47 }
 0x2e6   :  { %v345_v4 = vsel %vm305_vm2, %v344_v3, %v340_v2 }
 0x2e7   :  { %v347_v5 = vsel %vm308_vm3, %v345_v4, 0.0 }
 0x2e8   :  { %348 = vadd.xlane.f32.xlu1 %v347_v5 }
 0x375   :  { %v349_v6 = vpop.xlane.xlu1 %348 }
 0x376   :  { %658 = vrcp.f32 %v349_v6 }
 0x380   :  { %v659_v7 = vpop.eup %658 }
 0x381   :  { %v351_v8 = vmul.f32 %v659_v7, %v349_v6 }
 0x383   :  { %v352_v9 = vsub.f32 2.0, %v351_v8 }
 0x385   :  { %v353_v10 = vmul.f32 %v659_v7, %v352_v9 }
 0x387   :  { %v362_v11 = vrot.slane %v353_v10, %v319_v54  ;;  %v358_v12 = vrot.slane %v353_v10, %v898_v29 }
 0x389   :  { %v366_v13 = vmul.f32 %v657_v63, %v362_v11  ;;  %v365_v14 = vmul.f32 %v655_v62, %v358_v12 }
 0x38b   :  { %373 = vperm.xlu0 %649, %v366_v13  }
 0x38f   :  { %370 = vperm.xlu0 %649, %v365_v14  }
 0x40a   :  { %v374_v15 = vpop.permute.xlu0 %373 }
 0x40b   :  { %v382_v16 = vrot.slane %v374_v15, %v299_v47 }
 0x40d   :  { %620 = vmatmul.mubr.msk.f32.vlgmr.msra.gmra.mrb[2].mxu1 %vm386_vm4, %v382_v16 }
 0x40e   :  { %v371_v17 = vpop.permute.xlu0 %370 }
 0x40f   :  { %v378_v18 = vrot.slane %v371_v17, %v299_v47 }
 0x411   :  { %615 = vmatmul.mubr.msk.f32.vlgmr.msra.gmra.mrb[2].mxu0 %vm386_vm4, %v378_v18  ;;  %v383_v19 = vsel %vm305_vm2, %v382_v16, %v378_v18 }
 0x412   :  { %385 = vst.msk [vmem:[#allocation9] sm:$0x3] %vm308_vm3, %v383_v19 }
 0x413   :  { %737 = shalt.err (!%p734_p0)
}
 0x414   :  { %s738_s21 = scalar_lea.hbm %s949_s7, 32 }
 0x415   :  { %p739_p1 = scmp.ne.s32.totalorder %s949_s7, %s738_s21  ;;  %p742_p2 = scmp.lt.u32.totalorder %s738_s21, %s949_s7 }
 0x417   :  { %p744_p3 = pnand %p742_p2, %p739_p1 }
 0x419   :  { %747 = shalt.err (!%p744_p3)
}
 0x41a   :  { %557 = dma.vmem_to_hbm [thread:$0]  %s555_s17, 32, %s949_s7, [#allocation10]   ;;  %vm536_vm5 = vcmask 254976  }
 0x41b   :  { %s789_s28 = smov [#allocation8]  }
 0x41c   :  { %s544_s29 = sshll.u32 %s789_s28, 4  ;;  %s545_s29 = int_to_ptr.vmem [resolvable:$true] %s544_s29 }
 0x41d   :  { %s748_s30 = scalar_lea.vmem %s545_s29, 32  ;;  %p753_p5 = scmp.lt.s32.totalorder %s545_s29, %s545_s29 }
 0x41e   :  { %p749_p4 = scmp.ne.s32.totalorder %s545_s29, %s748_s30  ;;  %p754_p6 = scmp.lt.s32.totalorder %s748_s30, %s748_s30 }
 0x420   :  { %p755_p7 = por %p754_p6, %p753_p5 }
 0x422   :  { %p756_p8 = pnand %p755_p7, %p749_p4 }
 0x4e0   :  { %v527_v20 = vpop.f32.mrb[2].mxu1 }
 0x4e1   :  { %v621_v21 = vpop.f32.mrb[3].mxu1  ;;  %v533_v22 = vrot.slane %v527_v20, 7 }
 0x4e4   :  { %v455_v23 = vpop.f32.mrb[2].mxu0 }
 0x4e5   :  { %v534_v24 = vsel %vm305_vm2, %v533_v22, %v455_v23  ;;  %v616_v25 = vpop.f32.mrb[3].mxu0 }
 0x4e6   :  { %537 = vst.msk [vmem:[#allocation8] sm:$0x3] %vm536_vm5, %v534_v24 }
 0x4e7   :  { %759 = shalt.err (!%p756_p8)
}
 0x4e8   :  { %s760_s9 = scalar_lea.hbm %s948_s6, 32 }
 0x4e9   :  { %p761_p9 = scmp.ne.s32.totalorder %s948_s6, %s760_s9  ;;  %p764_p10 = scmp.lt.u32.totalorder %s760_s9, %s948_s6 }
 0x4eb   :  { %p766_p11 = pnand %p764_p10, %p761_p9 }
 0x4ed   :  { %769 = shalt.err (!%p766_p11)
}
 0x4ee   :  { %547 = dma.vmem_to_hbm [thread:$0]  %s545_s29, 32, %s948_s6, [#allocation4]  }
 0x4ef   :  { %774 = dma.done.wait [#allocation4], 32  }
 0x4f0   :  { %775 = vsyncadd [#allocation4], 4294967264 }
 0x4f1   :  { %776 = dma.done.wait [#allocation10], 32  }
 0x4f2   :  { %777 = vsyncadd [#allocation10], 4294967264 }
 0x4f3   :  { %564 = vsyncpa [#allocation3], 1 }
 0x4f4   :  { %565 = vsyncpa [#allocation6], 1 }
 0x4f5   :  { %566 = vsyncpa [#allocation4], 1 }
 0x4f6   :  { %567 = vsyncpa [#allocation10], 1 }

// kernel: tpu_custom_call.1
= control target key start
LH: loop header
LB: loop body
LE: loop exit
PB: predicated region body
PF: predicated region fallthrough
CT: control target
= control target key end

     0   :  { %13 = vsyncpa [#allocation3], 0  ;;  %s942_s0 = inlined_call_operand.hbm [shape: f32[2,8,32], index: 0, kind: input, shape index: {}]   ;;  %s943_s1 = inlined_call_operand.vmem [shape: f32[2,32], index: 1, kind: input, shape index: {}]   ;;  %s944_s2 = inlined_call_operand.hbm [shape: f32[32,32], index: 2, kind: input, shape index: {}]   ;;  %s945_s3 = inlined_call_operand.hbm [shape: f32[32,32], index: 3, kind: input, shape index: {}]   ;;  %s946_s4 = inlined_call_operand.vmem [shape: f32[1,32], index: 4, kind: input, shape index: {}]   ;;  %s947_s5 = inlined_call_operand.vmem [shape: f32[1,32], index: 5, kind: input, shape index: {}]   ;;  %s948_s6 = inlined_call_operand.hbm [shape: f32[2,32], index: 6, kind: output, shape index: {0}]   ;;  %s949_s7 = inlined_call_operand.hbm [shape: f32[2,8], index: 7, kind: output, shape index: {1}]  }
   0x1   :  { %14 = vsyncpa [#allocation6], 0 }
   0x2   :  { %15 = vsyncpa [#allocation4], 0 }
   0x3   :  { %16 = vsyncpa [#allocation10], 0  ;;  %s778_s24 = smov [#allocation5]   ;;  %s779_s26 = smov [#allocation2]  }
   0x4   :  { %s36_s25 = sshll.u32 %s778_s24, 4  ;;  %s22_s27 = sshll.u32 %s779_s26, 4  ;;  %s37_s25 = int_to_ptr.vmem [resolvable:$true] %s36_s25  ;;  %s830_s27 = int_to_ptr.vmem [resolvable:$true] %s22_s27 }
   0x5   :  { %s660_s30 = scalar_lea.hbm %s944_s2, 512 }
   0x6   :  { %p661_p0 = scmp.ne.s32.totalorder %s944_s2, %s660_s30  ;;  %p664_p1 = scmp.lt.u32.totalorder %s660_s30, %s944_s2 }
   0x8   :  { %p666_p2 = pnand %p664_p1, %p661_p0 }
   0xa   :  { %669 = shalt.err (!%p666_p2)
}
   0xb   :  { %s670_s12 = scalar_lea.vmem %s37_s25, 512  ;;  %p675_p4 = scmp.lt.s32.totalorder %s37_s25, %s37_s25 }
   0xc   :  { %p671_p3 = scmp.ne.s32.totalorder %s37_s25, %s670_s12  ;;  %p676_p5 = scmp.lt.s32.totalorder %s670_s12, %s670_s12 }
   0xe   :  { %p677_p6 = por %p676_p5, %p675_p4 }
  0x10   :  { %p678_p7 = pnand %p677_p6, %p671_p3 }
  0x12   :  { %681 = shalt.err (!%p678_p7)
}
  0x13   :  { %s780_s13 = smov 128   ;;  %s781_s14 = smov 8  }
  0x14   :  { %42 = dma.hbm_to_vmem [thread:$0]  %s944_s2, 512, %s37_s25, [#allocation6], %s780_s13, %s780_s13, %s781_s14  }
  0x15   :  { %s682_s19 = scalar_lea.hbm %s942_s0, 256 }
  0x16   :  { %p683_p8 = scmp.ne.s32.totalorder %s942_s0, %s682_s19  ;;  %p686_p9 = scmp.lt.u32.totalorder %s682_s19, %s942_s0 }
  0x18   :  { %p688_p10 = pnand %p686_p9, %p683_p8 }
  0x1a   :  { %691 = shalt.err (!%p688_p10)
}
  0x1b   :  { %s692_s24 = scalar_lea.vmem %s830_s27, 256  ;;  %p697_p12 = scmp.lt.s32.totalorder %s830_s27, %s830_s27 }
  0x1c   :  { %p693_p11 = scmp.ne.s32.totalorder %s830_s27, %s692_s24  ;;  %p698_p13 = scmp.lt.s32.totalorder %s692_s24, %s692_s24 }
  0x1e   :  { %p699_p0 = por %p698_p13, %p697_p12 }
  0x20   :  { %p700_p1 = pnand %p699_p0, %p693_p11 }
  0x22   :  { %703 = shalt.err (!%p700_p1)
}
  0x23   :  { %28 = dma.hbm_to_vmem [thread:$0]  %s942_s0, 256, %s830_s27, [#allocation3], %s780_s13, %s780_s13, %s781_s14  }
  0x24   :  { %s782_s26 = smov [#allocation7]   ;;  %s704_s8 = scalar_lea.hbm %s945_s3, 512 }
  0x25   :  { %s48_s28 = sshll.u32 %s782_s26, 4  ;;  %p705_p2 = scmp.ne.s32.totalorder %s945_s3, %s704_s8  ;;  %s49_s28 = int_to_ptr.vmem [resolvable:$true] %s48_s28 }
  0x26   :  { %p708_p3 = scmp.lt.u32.totalorder %s704_s8, %s945_s3 }
  0x28   :  { %p710_p4 = pnand %p708_p3, %p705_p2 }
  0x2a   :  { %713 = shalt.err (!%p710_p4)
}
  0x2b   :  { %s714_s15 = scalar_lea.vmem %s49_s28, 512  ;;  %p719_p6 = scmp.lt.s32.totalorder %s49_s28, %s49_s28 }
  0x2c   :  { %p715_p5 = scmp.ne.s32.totalorder %s49_s28, %s714_s15  ;;  %p720_p7 = scmp.lt.s32.totalorder %s714_s15, %s714_s15 }
  0x2e   :  { %p721_p8 = por %p720_p7, %p719_p6 }
  0x30   :  { %p722_p9 = pnand %p721_p8, %p715_p5 }
  0x32   :  { %725 = shalt.err (!%p722_p9)
}
  0x33   :  { %54 = dma.hbm_to_vmem [thread:$0]  %s945_s3, 512, %s49_s28, [#allocation6], %s780_s13, %s780_s13, %s781_s14  }
  0x34   :  { %770 = dma.done.wait [#allocation3], 256  }
  0x35   :  { %771 = vsyncadd [#allocation3], 4294967040 }
  0x36   :  { %772 = dma.done.wait [#allocation6], 1024  }
  0x37   :  { %773 = vsyncadd [#allocation6], 4294966272  ;;  %v783_v0 = vmov 0.0|0.0   ;;  %vm784_vm0 = vmmov 0   ;;  %v785_v1 = vmov 0.0   ;;  %v157_v2 = vld [vmem:[#allocation7] sm:$0xff]  ;;  %v245_v19 = vlaneseq }
  0x38   :  { %630 = vmatprep.subr.bf16.mxu1 %v783_v0  ;;  %609 = vmatprep.mubr.msk.f32.mxu1 %vm784_vm0, %v785_v1  ;;  %v158_v3 = vld [vmem:[#allocation7 + $0x8] sm:$0xff]  ;;  %v159_v4 = vld [vmem:[#allocation7 + $0x10] sm:$0xff]  ;;  %v160_v6 = vld [vmem:[#allocation7 + $0x18] sm:$0xff]  ;;  %vm74_vm1 = vcmask 261120   ;;  %v786_v17 = vmov 1966171168  }
  0x39   :  { %v631_v5 = vpack.c.bf16 %v158_v3, %v157_v2  ;;  %v70_v7 = vld [vmem:[#allocation5] sm:$0xff]  ;;  %v71_v8 = vld [vmem:[#allocation5 + $0x8] sm:$0xff]  ;;  %v72_v10 = vld [vmem:[#allocation5 + $0x10] sm:$0xff]  ;;  %v634_v12 = vpack.c.bf16 %v160_v6, %v159_v4  ;;  %v243_v18 = vunpack.c.l.s4 %v786_v17  ;;  %v891_v21 = vshrl.u32 %v245_v19, 7 }
  0x3a   :  { %v622_v9 = vpack.c.bf16 %v71_v8, %v70_v7  ;;  %v73_v11 = vld [vmem:[#allocation5 + $0x18] sm:$0xff]  ;;  %v68_v14 = vld [vmem:[#allocation2] sm:$0xff]  ;;  %v296_v45 = vand.u32 127, %v245_v19  ;;  %vm305_vm2 = vcmask 1041409   ;;  %vm308_vm3 = vcmask 58368  }
  0x3b   :  { %632 = vmatpush3.bf16.msra.mxu1 %v631_v5  ;;  %v626_v13 = vpack.c.bf16 %v73_v11, %v72_v10  ;;  %598 = vmatprep.mubr.msk.f32.mxu0 %vm74_vm1, %v68_v14  ;;  %v156_v15 = vld [vmem:[%s943_s1] sm:$0x3]  ;;  %v69_v16 = vld [vmem:[#allocation2 + $0x8] sm:$0xff]  ;;  %v244_v20 = vunpack.c.0.s8 %v243_v18  ;;  %v898_v29 = vsub.s32 0, %v891_v21  ;;  %v787_v53 = vmov 0  }
  0x3c   :  { %633 = vmatprep.subr.bf16.mxu1 %v783_v0  ;;  %623 = vmatprep.subr.bf16.mxu0 %v622_v9  ;;  %v570_v22 = vld [vmem:[%s946_s4] ss:$0 sm:$0xff]  ;;  %v299_v47 = vsub.s32 %v296_v45, %v891_v21  ;;  %v319_v54 = vsub.s32 1, %v891_v21  ;;  %vm386_vm4 = vcmask 64512  }
  0x3d   :  { %625 = vmatpush3.bf16.msra.mxu0 %v622_v9  ;;  %v247_v23 = vsub.s32 %v244_v20, %v891_v21  ;;  %v572_v38 = vld [vmem:[%s947_s5] ss:$0 sm:$0xff]  ;;  %649 = vset.pattern.permute.xlu0 %v787_v53  ;;  %s788_s5 = smov [#allocation9]  }
  0x3e   :  { %627 = vmatprep.subr.bf16.mxu0 %v626_v13  ;;  %648 = vset.pattern.permute.xlu1 %v787_v53  ;;  %s554_s17 = sshll.u32 %s788_s5, 4  ;;  %s555_s17 = int_to_ptr.vmem [resolvable:$true] %s554_s17 }
  0x3f   :  { %635 = vmatpush3.bf16.msra.mxu1 %v634_v12  ;;  %s726_s18 = scalar_lea.vmem %s555_s17, 32  ;;  %p731_p11 = scmp.lt.s32.totalorder %s555_s17, %s555_s17 }
  0x40   :  { %617 = vmatprep.subr.mxu1 %v785_v1  ;;  %p727_p10 = scmp.ne.s32.totalorder %s555_s17, %s726_s18  ;;  %p732_p12 = scmp.lt.s32.totalorder %s726_s18, %s726_s18 }
  0x41   :  { %629 = vmatpush3.bf16.msra.mxu0 %v626_v13 }
  0x42   :  { %610 = vmatmul.mubr.msk.f32.vlgmr.msra.gmra.mrb[0].mxu1 %vm74_vm1, %v156_v15  ;;  %612 = vmatprep.subr.mxu0 %v785_v1  ;;  %p733_p13 = por %p732_p12, %p731_p11 }
  0x43   :  { %618 = vmatpush3.msra.mxu1 %v69_v16  ;;  %619 = vmatprep.mubr.msk.f32.mxu1 %vm784_vm0, %v785_v1 }
  0x44   :  { %599 = vmatmul.mubr.msk.f32.vlgmr.msra.gmra.mrb[0].mxu0 %vm74_vm1, %v69_v16  ;;  %p734_p0 = pnand %p733_p13, %p727_p10 }
  0x45   :  { %613 = vmatpush3.msra.mxu0 %v68_v14  ;;  %614 = vmatprep.mubr.msk.f32.mxu0 %vm784_vm0, %v785_v1 }
 0x115   :  { %v237_v24 = vpop.f32.mrb[0].mxu1 }
 0x116   :  { %v238_v25 = vadd.f32 %v570_v22, %v237_v24  ;;  %v611_v26 = vpop.f32.mrb[1].mxu1 }
 0x117   :  { %v600_v27 = vpop.f32.mrb[0].mxu0 }
 0x118   :  { %v248_v28 = vrot.slane %v238_v25, %v247_v23  ;;  %v147_v30 = vpop.f32.mrb[1].mxu0 }
 0x11a   :  { %v249_v31 = vcombine.high %v248_v28, %v248_v28  ;;  %v256_v32 = vrot.slane %v248_v28, %v247_v23 }
 0x11c   :  { %v263_v33 = vrot.slane %v249_v31, %v247_v23  ;;  %v267_v34 = vrot.slane %v256_v32, %v898_v29 }
 0x11e   :  { %v271_v35 = vrot.slane %v263_v33, %v898_v29  ;;  %v274_v36 = vadd.f32 %v267_v34, %v147_v30 }
 0x120   :  { %v275_v37 = vadd.f32 %v600_v27, %v271_v35  ;;  %650 = vtanh.f32 %v274_v36 }
 0x122   :  { %652 = vtanh.f32 %v275_v37 }
 0x12a   :  { %v651_v39 = vpop.eup %650 }
 0x12b   :  { %v285_v40 = vmul.f32 %v651_v39, %v572_v38 }
 0x12c   :  { %v653_v41 = vpop.eup %652 }
 0x12d   :  { %v287_v42 = vsel %vm74_vm1, %v285_v40, 0.0  ;;  %v286_v43 = vmul.f32 %v653_v41, %v572_v38 }
 0x12e   :  { %288 = vadd.xlane.f32.xlu0 %v287_v42 }
 0x12f   :  { %v290_v44 = vsel %vm74_vm1, %v286_v43, 0.0 }
 0x132   :  { %291 = vadd.xlane.f32.xlu0 %v290_v44 }
 0x1bb   :  { %v289_v46 = vpop.xlane.xlu0 %288 }
 0x1bc   :  { %v300_v49 = vrot.slane %v289_v46, %v299_v47 }
 0x1bf   :  { %v292_v48 = vpop.xlane.xlu0 %291 }
 0x1c0   :  { %v304_v50 = vrot.slane %v292_v48, %v299_v47 }
 0x1c2   :  { %v306_v51 = vsel %vm305_vm2, %v304_v50, %v300_v49 }
 0x1c3   :  { %v309_v52 = vsel %vm308_vm3, %v306_v51, -inf }
 0x1c4   :  { %310 = vmax.xlane.f32.xlu1 %v309_v52 }
 0x251   :  { %v311_v55 = vpop.xlane.xlu1 %310 }
 0x252   :  { %v316_v56 = vrot.slane %v311_v55, %v898_v29  ;;  %v320_v57 = vrot.slane %v311_v55, %v319_v54 }
 0x254   :  { %v323_v58 = vsub.f32 %v289_v46, %v316_v56  ;;  %v324_v59 = vsub.f32 %v292_v48, %v320_v57 }
 0x256   :  { %v325_v60 = vmul.f32 1.442695, %v323_v58  ;;  %v327_v61 = vmul.f32 1.442695, %v324_v59 }
 0x258   :  { %654 = vpow2.f32 %v325_v60 }
 0x259   :  { %656 = vpow2.f32 %v327_v61 }
 0x262   :  { %v655_v62 = vpop.eup %654 }
 0x263   :  { %v657_v63 = vpop.eup %656  ;;  %332 = vperm.xlu1 %648, %v655_v62  }
 0x264   :  { %335 = vperm.xlu0 %649, %v657_v63  }
 0x2e2   :  { %v333_v0 = vpop.permute.xlu1 %332 }
 0x2e3   :  { %v336_v1 = vpop.permute.xlu0 %335  ;;  %v340_v2 = vrot.slane %v333_v0, %v299_v47 }
 0x2e4   :  { %v344_v3 = vrot.slane %v336_v1, %v299_v47 }
 0x2e6   :  { %v345_v4 = vsel %vm305_vm2, %v344_v3, %v340_v2 }
 0x2e7   :  { %v347_v5 = vsel %vm308_vm3, %v345_v4, 0.0 }
 0x2e8   :  { %348 = vadd.xlane.f32.xlu1 %v347_v5 }
 0x375   :  { %v349_v6 = vpop.xlane.xlu1 %348 }
 0x376   :  { %658 = vrcp.f32 %v349_v6 }
 0x380   :  { %v659_v7 = vpop.eup %658 }
 0x381   :  { %v351_v8 = vmul.f32 %v659_v7, %v349_v6 }
 0x383   :  { %v352_v9 = vsub.f32 2.0, %v351_v8 }
 0x385   :  { %v353_v10 = vmul.f32 %v659_v7, %v352_v9 }
 0x387   :  { %v362_v11 = vrot.slane %v353_v10, %v319_v54  ;;  %v358_v12 = vrot.slane %v353_v10, %v898_v29 }
 0x389   :  { %v366_v13 = vmul.f32 %v657_v63, %v362_v11  ;;  %v365_v14 = vmul.f32 %v655_v62, %v358_v12 }
 0x38b   :  { %373 = vperm.xlu0 %649, %v366_v13  }
 0x38f   :  { %370 = vperm.xlu0 %649, %v365_v14  }
 0x40a   :  { %v374_v15 = vpop.permute.xlu0 %373 }
 0x40b   :  { %v382_v16 = vrot.slane %v374_v15, %v299_v47 }
 0x40d   :  { %620 = vmatmul.mubr.msk.f32.vlgmr.msra.gmra.mrb[2].mxu1 %vm386_vm4, %v382_v16 }
 0x40e   :  { %v371_v17 = vpop.permute.xlu0 %370 }
 0x40f   :  { %v378_v18 = vrot.slane %v371_v17, %v299_v47 }
 0x411   :  { %615 = vmatmul.mubr.msk.f32.vlgmr.msra.gmra.mrb[2].mxu0 %vm386_vm4, %v378_v18  ;;  %v383_v19 = vsel %vm305_vm2, %v382_v16, %v378_v18 }
 0x412   :  { %385 = vst.msk [vmem:[#allocation9] sm:$0x3] %vm308_vm3, %v383_v19 }
 0x413   :  { %737 = shalt.err (!%p734_p0)
}
 0x414   :  { %s738_s21 = scalar_lea.hbm %s949_s7, 32 }
 0x415   :  { %p739_p1 = scmp.ne.s32.totalorder %s949_s7, %s738_s21  ;;  %p742_p2 = scmp.lt.u32.totalorder %s738_s21, %s949_s7 }
 0x417   :  { %p744_p3 = pnand %p742_p2, %p739_p1 }
 0x419   :  { %747 = shalt.err (!%p744_p3)
}
 0x41a   :  { %557 = dma.vmem_to_hbm [thread:$0]  %s555_s17, 32, %s949_s7, [#allocation10]   ;;  %vm536_vm5 = vcmask 254976  }
 0x41b   :  { %s789_s28 = smov [#allocation8]  }
 0x41c   :  { %s544_s29 = sshll.u32 %s789_s28, 4  ;;  %s545_s29 = int_to_ptr.vmem [resolvable:$true] %s544_s29 }
 0x41d   :  { %s748_s30 = scalar_lea.vmem %s545_s29, 32  ;;  %p753_p5 = scmp.lt.s32.totalorder %s545_s29, %s545_s29 }
 0x41e   :  { %p749_p4 = scmp.ne.s32.totalorder %s545_s29, %s748_s30  ;;  %p754_p6 = scmp.lt.s32.totalorder %s748_s30, %s748_s30 }
 0x420   :  { %p755_p7 = por %p754_p6, %p753_p5 }
 0x422   :  { %p756_p8 = pnand %p755_p7, %p749_p4 }
 0x4e0   :  { %v527_v20 = vpop.f32.mrb[2].mxu1 }
 0x4e1   :  { %v621_v21 = vpop.f32.mrb[3].mxu1  ;;  %v533_v22 = vrot.slane %v527_v20, 7 }
 0x4e4   :  { %v455_v23 = vpop.f32.mrb[2].mxu0 }
 0x4e5   :  { %v534_v24 = vsel %vm305_vm2, %v533_v22, %v455_v23  ;;  %v616_v25 = vpop.f32.mrb[3].mxu0 }
 0x4e6   :  { %537 = vst.msk [vmem:[#allocation8] sm:$0x3] %vm536_vm5, %v534_v24 }
 0x4e7   :  { %759 = shalt.err (!%p756_p8)
}
 0x4e8   :  { %s760_s9 = scalar_lea.hbm %s948_s6, 32 }
 0x4e9   :  { %p761_p9 = scmp.ne.s32.totalorder %s948_s6, %s760_s9  ;;  %p764_p10 = scmp.lt.u32.totalorder %s760_s9, %s948_s6 }
 0x4eb   :  { %p766_p11 = pnand %p764_p10, %p761_p9 }
 0x4ed   :  { %769 = shalt.err (!%p766_p11)
}
 0x4ee   :  { %547 = dma.vmem_to_hbm [thread:$0]  %s545_s29, 32, %s948_s6, [#allocation4]  }
 0x4ef   :  { %774 = dma.done.wait [#allocation4], 32  }
 0x4f0   :  { %775 = vsyncadd [#allocation4], 4294967264 }
 0x4f1   :  { %776 = dma.done.wait [#allocation10], 32  }
 0x4f2   :  { %777 = vsyncadd [#allocation10], 4294967264 }
 0x4f3   :  { %564 = vsyncpa [#allocation3], 1 }
 0x4f4   :  { %565 = vsyncpa [#allocation6], 1 }
 0x4f5   :  { %566 = vsyncpa [#allocation4], 1 }
 0x4f6   :  { %567 = vsyncpa [#allocation10], 1 }

</bundles_post_ra>
